<compile_context>
chip_gen: v7x
topology: tpu7x:2x2x1
jax: 0.10.0
libtpu: 0.0.40
codegen_flags: <defaults>
</compile_context>

<pallas_src>
import functools

import jax
import jax.numpy as jnp
from jax import lax
from jax.experimental import pallas as pl
from jax.experimental.pallas import tpu as pltpu


def _attn_pos_kernel(q_ref, k_ref, v_ref, kg_ref, o_ref, *, scale):
    # Shapes (batch dim squeezed away by the BlockSpecs):
    #   q_ref: (TQ, D)  k_ref: (Lk, D)  v_ref: (Lk, Dv)  kg_ref: (TQ, Lk)
    q = q_ref[...]
    if scale and scale != 1:  # matches PyTorch `if scale:` truthiness
        # Fold the scale into Q: TQ*D VPU multiplies instead of TQ*Lk.
        q = q * jnp.asarray(scale, dtype=q.dtype)

    # attention = Q @ K^T : contract the last dim of both operands directly so
    # K is consumed in its natural layout (no transposed copy), MXU f32 accum.
    att = lax.dot_general(
        q, k_ref[...],
        dimension_numbers=(((1,), (1,)), ((), ())),
        preferred_element_type=jnp.float32,
    )  # (TQ, Lk) f32

    # softmax over the key axis (f32 math).
    att = att - jnp.max(att, axis=-1, keepdims=True)
    att = jnp.exp(att)
    att = att * pl.reciprocal(jnp.sum(att, axis=-1, keepdims=True), approx=True)

    # beta = attention * kg_sim, then softmax again.
    # (max-subtraction kept: kg_sim boundedness is not guaranteed by the spec.)
    beta = att * kg_ref[...].astype(jnp.float32)
    beta = beta - jnp.max(beta, axis=-1, keepdims=True)
    beta = jnp.exp(beta)
    beta = beta * pl.reciprocal(jnp.sum(beta, axis=-1, keepdims=True), approx=True)

    # context = beta @ V — feed the MXU in V's native dtype (bf16 path if bf16).
    ctx = jnp.dot(beta.astype(v_ref.dtype), v_ref[...],
                  preferred_element_type=jnp.float32)  # (TQ, Dv)
    o_ref[...] = ctx.astype(o_ref.dtype)


def _pick_query_tile(lq, lk, d, dv, itemsize, vmem_budget=48 * 1024 * 1024):
    """Largest query tile that (a) evenly divides Lq, (b) is a multiple of 8
    when tiling (sublane constraint), and (c) keeps the per-step working set
    within a conservative VMEM budget (valid even on v7x's 64 MiB/TC)."""
    def footprint(tq):
        resident = lk * (d + dv) * itemsize * 2          # K, V (double-buffered)
        streamed = 2 * tq * (d + lk + dv) * itemsize     # Q, kg, out (double-buffered)
        temps = 2 * tq * lk * 4                          # att + beta in f32
        return resident + streamed + temps

    if lq <= 256 or lq % 8 != 0:
        return lq  # small or awkward Lq: one tile (block == full dim is legal)

    candidates = [t for t in (512, 256, 128, 64, 32, 16, 8)
                  if t <= lq and lq % t == 0]
    for t in candidates:
        if footprint(t) <= vmem_budget:
            return t
    return candidates[-1] if candidates else lq


def scaled_dot_product_attention_pos(Q, K, V, scale, kg_sim):
    """Pallas TPU implementation of Scaled_Dot_Product_Attention_pos.forward.

    Note: for long sequences, passing kg_sim as bf16 at the call site halves the
    dominant HBM stream; the kernel upcasts it to f32 internally either way.
    """
    B, Lq, D = Q.shape
    _, Lk, Dk = K.shape
    _, Lv, Dv = V.shape
    assert D == Dk and Lk == Lv
    assert kg_sim.shape == (B, Lq, Lk)

    out_dtype = Q.dtype
    TQ = _pick_query_tile(Lq, Lk, D, Dv, jnp.dtype(Q.dtype).itemsize)
    grid = (B, Lq // TQ)

    kernel = functools.partial(_attn_pos_kernel, scale=scale)

    bytes_accessed = (
        Q.size * Q.dtype.itemsize
        + K.size * K.dtype.itemsize
        + V.size * V.dtype.itemsize
        + kg_sim.size * kg_sim.dtype.itemsize
        + B * Lq * Dv * jnp.dtype(out_dtype).itemsize
    )

    out = pl.pallas_call(
        kernel,
        out_shape=jax.ShapeDtypeStruct((B, Lq, Dv), out_dtype),
        grid_spec=pltpu.PrefetchScalarGridSpec(
            num_scalar_prefetch=0,
            grid=grid,
            in_specs=[
                # Q: tiled along the query axis.
                pl.BlockSpec((pl.Squeezed(), TQ, D), lambda b, i: (b, i, 0)),
                # K, V: full per batch; constant index along the query axis, so
                # they stay resident in VMEM across query tiles.
                pl.BlockSpec((pl.Squeezed(), Lk, D), lambda b, i: (b, 0, 0)),
                pl.BlockSpec((pl.Squeezed(), Lk, Dv), lambda b, i: (b, 0, 0)),
                # kg_sim: the large quadratic stream, tiled along queries.
                pl.BlockSpec((pl.Squeezed(), TQ, Lk), lambda b, i: (b, i, 0)),
            ],
            out_specs=pl.BlockSpec((pl.Squeezed(), TQ, Dv), lambda b, i: (b, i, 0)),
        ),
        compiler_params=pltpu.CompilerParams(
            dimension_semantics=("parallel", "parallel"),
            vmem_limit_bytes=64 * 1024 * 1024,
        ),
        cost_estimate=pl.CostEstimate(
            flops=2 * B * Lq * Lk * (D + Dv),
            transcendentals=2 * B * Lq * Lk,
            bytes_accessed=bytes_accessed,
        ),
    )(Q, K, V, kg_sim)
    return out


def _reference(Q, K, V, scale, kg_sim):
    att = jnp.einsum("bqd,bkd->bqk", Q, K)
    if scale:
        att = att * scale
    att = jax.nn.softmax(att, axis=-1)
    beta = att * kg_sim
    beta = jax.nn.softmax(beta, axis=-1)
    return jnp.einsum("bqk,bkd->bqd", beta, V)


if __name__ == "__main__":
    key = jax.random.PRNGKey(0)
    k1, k2, k3, k4 = jax.random.split(key, 4)

    B, Lq, Lk, D, Dv = 2, 8, 8, 32, 32
    Q = jax.random.normal(k1, (B, Lq, D), dtype=jnp.float32)
    K = jax.random.normal(k2, (B, Lk, D), dtype=jnp.float32)
    V = jax.random.normal(k3, (B, Lk, Dv), dtype=jnp.float32)
    kg_sim = jax.random.uniform(k4, (B, Lq, Lk), dtype=jnp.float32)
    scale = 1.0 / (D ** 0.5)

    out = scaled_dot_product_attention_pos(Q, K, V, scale, kg_sim)
    out = jax.block_until_ready(out)

    ref = _reference(Q, K, V, scale, kg_sim)
    assert out.shape == (B, Lq, Dv)
    assert out.dtype == Q.dtype
    # Tolerance loosened (vs 1e-5) because the softmax denominators use the
    # EUP approximate reciprocal.
    assert jnp.allclose(out, ref, atol=2e-2, rtol=2e-2), "mismatch vs reference"

    print("KERNEL_OK")
</pallas_src>

<mosaic_0001>
module attributes {stable_mosaic.version = 11 : i64} {
  func.func @_attn_pos_kernel(%arg0: i32, %arg1: i32, %arg2: memref<1x8x32xf32, #tpu.memory_space<vmem>>, %arg3: memref<1x8x32xf32, #tpu.memory_space<vmem>>, %arg4: memref<1x8x32xf32, #tpu.memory_space<vmem>>, %arg5: memref<1x8x8xf32, #tpu.memory_space<vmem>>, %arg6: memref<1x8x32xf32, #tpu.memory_space<vmem>>) attributes {dimension_semantics = [#tpu.dimension_semantics<parallel>, #tpu.dimension_semantics<parallel>], iteration_bounds = array<i64: 2, 1>, scalar_prefetch = 0 : i64, scratch_operands = 0 : i64, tpu.core_type = #tpu.core_type<tc>, window_params = [{transform_indices = @transform_0, window_bounds = array<i64: 1, 8, 32>}, {transform_indices = @transform_1, window_bounds = array<i64: 1, 8, 32>}, {transform_indices = @transform_2, window_bounds = array<i64: 1, 8, 32>}, {transform_indices = @transform_3, window_bounds = array<i64: 1, 8, 8>}, {transform_indices = @transform_4, window_bounds = array<i64: 1, 8, 32>}]} {
    %c0 = arith.constant 0 : index
    %c0_0 = arith.constant 0 : index
    %c0_1 = arith.constant 0 : index
    %0 = vector.load %arg2[%c0, %c0_0, %c0_1] : memref<1x8x32xf32, #tpu.memory_space<vmem>>, vector<1x8x32xf32>
    %1 = vector.shape_cast %0 : vector<1x8x32xf32> to vector<8x32xf32>
    %cst = arith.constant 0.176776692 : f32
    %2 = vector.broadcast %cst : f32 to vector<8x32xf32>
    %3 = arith.mulf %1, %2 : vector<8x32xf32>
    %c0_2 = arith.constant 0 : index
    %c0_3 = arith.constant 0 : index
    %c0_4 = arith.constant 0 : index
    %4 = vector.load %arg3[%c0_2, %c0_3, %c0_4] : memref<1x8x32xf32, #tpu.memory_space<vmem>>, vector<1x8x32xf32>
    %5 = vector.shape_cast %4 : vector<1x8x32xf32> to vector<8x32xf32>
    %cst_5 = arith.constant dense<0.000000e+00> : vector<8x8xf32>
    %6 = tpu.matmul %3, %5, %cst_5 {dimension_numbers = #tpu.dot_dimension_numbers<[1], [1], [0], [0], [0, 0, 1, 0], [], []>} : vector<8x32xf32>, vector<8x32xf32>, vector<8x8xf32> -> vector<8x8xf32>
    %cst_6 = arith.constant dense<0xFF800000> : vector<8xf32>
    %7 = vector.multi_reduction <maximumf>, %6, %cst_6 [1] : vector<8x8xf32> to vector<8xf32>
    %8 = vector.shape_cast %7 : vector<8xf32> to vector<8x1xf32>
    %9 = vector.broadcast %8 : vector<8x1xf32> to vector<8x8xf32>
    %10 = arith.subf %6, %9 : vector<8x8xf32>
    %11 = math.exp %10 : vector<8x8xf32>
    %cst_7 = arith.constant dense<0.000000e+00> : vector<8xf32>
    %12 = vector.multi_reduction <add>, %11, %cst_7 [1] : vector<8x8xf32> to vector<8xf32>
    %13 = vector.shape_cast %12 : vector<8xf32> to vector<8x1xf32>
    %14 = tpu.reciprocal %13 {approx = true} : vector<8x1xf32> -> vector<8x1xf32>
    %15 = vector.broadcast %14 : vector<8x1xf32> to vector<8x8xf32>
    %16 = arith.mulf %11, %15 : vector<8x8xf32>
    %c0_8 = arith.constant 0 : index
    %c0_9 = arith.constant 0 : index
    %c0_10 = arith.constant 0 : index
    %17 = vector.load %arg5[%c0_8, %c0_9, %c0_10] : memref<1x8x8xf32, #tpu.memory_space<vmem>>, vector<1x8x8xf32>
    %18 = vector.shape_cast %17 : vector<1x8x8xf32> to vector<8x8xf32>
    %19 = arith.mulf %16, %18 : vector<8x8xf32>
    %cst_11 = arith.constant dense<0xFF800000> : vector<8xf32>
    %20 = vector.multi_reduction <maximumf>, %19, %cst_11 [1] : vector<8x8xf32> to vector<8xf32>
    %21 = vector.shape_cast %20 : vector<8xf32> to vector<8x1xf32>
    %22 = vector.broadcast %21 : vector<8x1xf32> to vector<8x8xf32>
    %23 = arith.subf %19, %22 : vector<8x8xf32>
    %24 = math.exp %23 : vector<8x8xf32>
    %cst_12 = arith.constant dense<0.000000e+00> : vector<8xf32>
    %25 = vector.multi_reduction <add>, %24, %cst_12 [1] : vector<8x8xf32> to vector<8xf32>
    %26 = vector.shape_cast %25 : vector<8xf32> to vector<8x1xf32>
    %27 = tpu.reciprocal %26 {approx = true} : vector<8x1xf32> -> vector<8x1xf32>
    %28 = vector.broadcast %27 : vector<8x1xf32> to vector<8x8xf32>
    %29 = arith.mulf %24, %28 : vector<8x8xf32>
    %c0_13 = arith.constant 0 : index
    %c0_14 = arith.constant 0 : index
    %c0_15 = arith.constant 0 : index
    %30 = vector.load %arg4[%c0_13, %c0_14, %c0_15] : memref<1x8x32xf32, #tpu.memory_space<vmem>>, vector<1x8x32xf32>
    %31 = vector.shape_cast %30 : vector<1x8x32xf32> to vector<8x32xf32>
    %cst_16 = arith.constant dense<0.000000e+00> : vector<8x32xf32>
    %32 = tpu.matmul %29, %31, %cst_16 {dimension_numbers = #tpu.dot_dimension_numbers<[1], [0], [0], [1], [0, 0, 1, 1], [], []>} : vector<8x8xf32>, vector<8x32xf32>, vector<8x32xf32> -> vector<8x32xf32>
    %c0_17 = arith.constant 0 : index
    %c0_18 = arith.constant 0 : index
    %c0_19 = arith.constant 0 : index
    %33 = vector.load %arg6[%c0_17, %c0_18, %c0_19] : memref<1x8x32xf32, #tpu.memory_space<vmem>>, vector<1x8x32xf32>
    %34 = vector.shape_cast %33 : vector<1x8x32xf32> to vector<8x32xf32>
    %35 = vector.shape_cast %32 : vector<8x32xf32> to vector<1x8x32xf32>
    tpu.vector_store %arg6[%c0_17, %c0_18, %c0_19], %35 {strides = array<i32>} : memref<1x8x32xf32, #tpu.memory_space<vmem>>, vector<1x8x32xf32>,
    return
  }
  func.func @transform_0(%arg0: i32, %arg1: i32) -> (i32, i32, i32) {
    %c0_i32 = arith.constant 0 : i32
    %c0_i32_0 = arith.constant 0 : i32
    return %arg0, %arg1, %c0_i32 : i32, i32, i32
  }
  func.func @transform_1(%arg0: i32, %arg1: i32) -> (i32, i32, i32) {
    %c0_i32 = arith.constant 0 : i32
    %c0_i32_0 = arith.constant 0 : i32
    %c0_i32_1 = arith.constant 0 : i32
    return %arg0, %c0_i32, %c0_i32_0 : i32, i32, i32
  }
  func.func @transform_2(%arg0: i32, %arg1: i32) -> (i32, i32, i32) {
    %c0_i32 = arith.constant 0 : i32
    %c0_i32_0 = arith.constant 0 : i32
    %c0_i32_1 = arith.constant 0 : i32
    return %arg0, %c0_i32, %c0_i32_0 : i32, i32, i32
  }
  func.func @transform_3(%arg0: i32, %arg1: i32) -> (i32, i32, i32) {
    %c0_i32 = arith.constant 0 : i32
    %c0_i32_0 = arith.constant 0 : i32
    return %arg0, %arg1, %c0_i32 : i32, i32, i32
  }
  func.func @transform_4(%arg0: i32, %arg1: i32) -> (i32, i32, i32) {
    %c0_i32 = arith.constant 0 : i32
    %c0_i32_0 = arith.constant 0 : i32
    return %arg0, %arg1, %c0_i32 : i32, i32, i32
  }
}

</mosaic_0001>

<bundles_post_ra>
// kernel: tpu_custom_call.1
= control target key start
LH: loop header
LB: loop body
LE: loop exit
PB: predicated region body
PF: predicated region fallthrough
CT: control target
= control target key end

     0   :  { %s1358_s0 = inlined_call_operand.hbm [shape: f32[2,8,32], index: 0, kind: input, shape index: {}]   ;;  %s1359_s1 = inlined_call_operand.hbm [shape: f32[2,8,32], index: 1, kind: input, shape index: {}]   ;;  %s1360_s2 = inlined_call_operand.hbm [shape: f32[2,8,32], index: 2, kind: input, shape index: {}]   ;;  %s1361_s3 = inlined_call_operand.hbm [shape: f32[2,8,8], index: 3, kind: input, shape index: {}]   ;;  %s1362_s4 = inlined_call_operand.hbm [shape: f32[2,8,32], index: 4, kind: output, shape index: {}]  }
   0x1   :  { %1372 = sst [smem:[#allocation20_spill]] %s1359_s1 }
   0x2   :  { %9 = vsyncpa [#allocation3], 0 }
   0x3   :  { %11 = vsyncpa [#allocation3 + $0x1], 0 }
   0x4   :  { %12 = vsyncpa [#allocation6], 0 }
   0x5   :  { %14 = vsyncpa [#allocation6 + $0x1], 0 }
   0x6   :  { %15 = vsyncpa [#allocation9], 0 }
   0x7   :  { %17 = vsyncpa [#allocation9 + $0x1], 0 }
   0x8   :  { %18 = vsyncpa [#allocation4], 0 }
   0x9   :  { %20 = vsyncpa [#allocation4 + $0x1], 0  ;;  %s1053_s15 = smov 0   ;;  %s1055_s16 = smov 0  }
   0xa   :  { %s1057_s17 = smov 0   ;;  %s1059_s18 = smov 0  }
   0xb   :  { %s1061_s19 = smov 0   ;;  %s1063_s20 = smov 0  }
   0xc LB: > { %1373 = sst [smem:[#allocation15_spill]] %s1007_s17  ;;  %s1084_s21 = sadd.s32 4294967295, %s1019_s20   ;;  %s1019_s20 = sphi %s1063_s20, %s26_s20   ;;  %s1015_s19 = sphi %s1061_s19, %s1399_s19   ;;  %s1011_s18 = sphi %s1059_s18, %s1398_s18   ;;  %s1007_s17 = sphi %s1057_s17, %s1397_s17   ;;  %s1003_s16 = sphi %s1055_s16, %s1401_s16   ;;  %s999_s15 = sphi %s1053_s15, %s1400_s15  }
   0xd   : > { %1374 = sst [smem:[#allocation16_spill]] %s1015_s19  ;;  %s684_s22 = sadd.s32 4294967294, %s1019_s20  }
   0xe   : > { %1375 = sst [smem:[#allocation17_spill]] %s1019_s20  ;;  %s38_s23 = sadd.s32 1, %s1015_s19 }
   0xf   : > { %s47_s24 = sadd.s32 1, %s1007_s17  ;;  %p40_p0 = scmp.ge.s32.totalorder %s38_s23, 2 }
  0x10   : > { %p54_p1 = scmp.ne.s32.totalorder %s1007_s17, %s1003_s16  ;;  %p55_p2 = scmp.eq.s32.totalorder %s1019_s20, 0 }
  0x11   : > { %p60_p3 = scmp.ne.s32.totalorder %s1003_s16, %s999_s15  ;;  %s1403_s23 = smov (%p40_p0, %s38_s23), 0 }
  0x12   : > { %1376 = sst [smem:[#allocation18_spill]] %s1403_s23  ;;  %p1096_p4 = por %p55_p2, %p54_p1 }
  0x13   : > { %p61_p5 = scmp.eq.s32.totalorder %s1084_s21, 0  ;;  %s42_s26 = ssub.s32 %s1015_s19, %s1403_s23 }
  0x14   : > { %p166_p6 = scmp.eq.s32.totalorder %s1084_s21, 1  ;;  %p45_p7 = scmp.eq.s32.totalorder %s42_s26, 0 }
  0x15   : > { %p1104_p8 = por %p61_p5, %p60_p3  ;;  %p172_p10 = scmp.eq.s32.totalorder %s684_s22, 1 }
  0x16   : > { %p1108_p9 = por %p166_p6, %p54_p1  ;;  %p749_p13 = scmp.lt.s32.totalorder %s1019_s20, 2 }
  0x17   : > { %s1378_s27 = scalar_select %p1104_p8, 1, 0 }
  0x18   : > { %s1379_s28 = scalar_select %p1108_p9, 1, 0 }
  0x19   : > { %s1113_s29 = scalar_select %p45_p7, %s1007_s17, %s47_s24  }
  0x1a   : > { %p1115_p11 = por %p172_p10, %p60_p3  ;;  %s1122_s5 = sand.u32 1, %s1007_s17  }
  0x1b   : > { %1380 = sst [smem:[#allocation19_spill]] %s1113_s29  ;;  %s1125_s6 = sshll.u32 %s1122_s5, 3 }
  0x1c   : > { %s1381_s30 = scalar_select %p1115_p11, 1, 0 }
  0x1d   : > { %s1128_s7 = sshll.u32 %s1015_s19, 7  ;;  %p1132_p0 = pnand %p749_p13, %p1096_p4 }
  0x1e   : > { %s211_s9 = sand.u32 1, %s1019_s20   ;;  %s1383_s1 = sld [smem:[#allocation20_spill]] }
  0x1f   : > { %s1382_s8 = scalar_select %p1132_p0, 1, 0 }
  0x20   : > { %s215_s13 = scalar_lea.vmem [#allocation5], %s1125_s6  ;;  %s1148_s22 = scalar_lea.sflag [#allocation6], %s211_s9 }
  0x21   : > { %s222_s14 = sshll.u32 %s215_s13, 4  ;;  %p1154_p4 = pneg %p1132_p0  ;;  %s1145_s14 = int_to_ptr.vmem [resolvable:$true] %s222_s14 }
  0x24   : > { %s1141_s12 = scalar_lea.hbm %s1383_s1, %s1128_s7  ;;  %s814_s11 = scalar_lea.hbm %s1383_s1, 256 }
  0x25   : > { %s809_s24 = scalar_lea.hbm %s1141_s12, 128  ;;  %p815_p7 = scmp.lt.u32.totalorder %s1141_s12, %s1383_s1 }
  0x26   : > { %p810_p3 = scmp.ne.s32.totalorder %s1141_s12, %s809_s24  ;;  %p816_p10 = scmp.lt.u32.totalorder %s814_s11, %s809_s24 }
  0x27   : > { %p818_p12 = scmp.lt.u32.totalorder %s809_s24, %s1141_s12 }
  0x28   : > { %p812_p5 = pnand %p1154_p4, %p810_p3  ;;  %p817_p13 = por %p816_p10, %p815_p7 }
  0x2a   : > { %p813_p6 = pneg %p812_p5  ;;  %p819_p1 = por %p818_p12, %p817_p13 }
  0x2c   : > { %p820_p2 = pnand %p819_p1, %p813_p6 }
  0x2e   : > { %823 = shalt.err (!%p820_p2)
}
  0x2f   : > { %s824_s9 = scalar_lea.vmem %s1145_s14, 128  ;;  %s1021_s26 = smov [#allocation5]  }
  0x30   : > { %p825_p3 = scmp.ne.s32.totalorder %s1145_s14, %s824_s9  ;;  %s829_s10 = sshll.u32 %s1021_s26, 4  ;;  %s830_s10 = int_to_ptr.vmem [resolvable:$false] %s829_s10 }
  0x31   : > { %s831_s23 = scalar_lea.vmem %s830_s10, 256  ;;  %p832_p9 = scmp.lt.s32.totalorder %s1145_s14, %s830_s10 }
  0x32   : > { %p827_p5 = pnand %p825_p3, %p1154_p4  ;;  %p833_p8 = scmp.lt.s32.totalorder %s831_s23, %s824_s9 }
  0x34   : > { %p828_p11 = pneg %p827_p5  ;;  %p834_p7 = por %p833_p8, %p832_p9 }
  0x36   : > { %p835_p10 = pnand %p834_p7, %p828_p11 }
  0x38   : > { %838 = shalt.err (!%p835_p10)
}
  0x39   : > { %738 = dma.hbm_to_vmem [thread:$0]  (!%p1132_p0), %s1141_s12, 128, %s1145_s14, %s1148_s22  }
  0x3a   : > { %p1385_p12 = scmp.lt.s32.totalorder %s1019_s20, 3  ;;  %p1386_p1 = scmp.ge.s32.totalorder %s1019_s20, 1 }
  0x3b   : > { %s1190_s9 = scalar_lea.hbm %s1358_s0, %s1128_s7  ;;  %s196_s26 = scalar_lea.vmem [#allocation2], %s1125_s6 }
  0x3c   : > { %p1182_p2 = pnand %p1386_p1, %p1385_p12  ;;  %s204_s10 = sshll.u32 %s196_s26, 4  ;;  %s1193_s10 = int_to_ptr.vmem [resolvable:$true] %s204_s10 }
  0x3d   : > { %s1199_s23 = scalar_lea.hbm %s1360_s2, %s1128_s7  ;;  %s193_s1 = scalar_lea.sflag [#allocation3], %s1122_s5 }
  0x3e   : > { %s1387_s24 = scalar_select %p1182_p2, 1, 0 }
  0x3f   : > { %s839_s19 = scalar_lea.hbm %s1190_s9, 128  ;;  %s844_s29 = scalar_lea.hbm %s1358_s0, 256 }
  0x40   : > { %p840_p8 = scmp.ne.s32.totalorder %s1190_s9, %s839_s19  ;;  %p845_p6 = scmp.lt.u32.totalorder %s1190_s9, %s1358_s0 }
  0x41   : > { %p846_p13 = scmp.lt.u32.totalorder %s844_s29, %s839_s19  ;;  %p848_p5 = scmp.lt.u32.totalorder %s839_s19, %s1190_s9 }
  0x42   : > { %p842_p9 = pnand %p840_p8, %p1154_p4 }
  0x43   : > { %p847_p3 = por %p846_p13, %p845_p6 }
  0x44   : > { %p843_p11 = pneg %p842_p9 }
  0x45   : > { %p849_p7 = por %p848_p5, %p847_p3 }
  0x47   : > { %p850_p10 = pnand %p849_p7, %p843_p11 }
  0x49   : > { %853 = shalt.err (!%p850_p10)
}
  0x4a   : > { %s854_s26 = scalar_lea.vmem %s1193_s10, 128  ;;  %s1022_s12 = smov [#allocation2]  }
  0x4b   : > { %p855_p12 = scmp.ne.s32.totalorder %s1193_s10, %s854_s26  ;;  %s859_s14 = sshll.u32 %s1022_s12, 4  ;;  %s860_s14 = int_to_ptr.vmem [resolvable:$false] %s859_s14 }
  0x4c   : > { %s861_s17 = scalar_lea.vmem %s860_s14, 256  ;;  %p862_p9 = scmp.lt.s32.totalorder %s1193_s10, %s860_s14 }
  0x4d   : > { %p857_p1 = pnand %p855_p12, %p1154_p4  ;;  %p863_p2 = scmp.lt.s32.totalorder %s861_s17, %s854_s26 }
  0x4f   : > { %p858_p8 = pneg %p857_p1  ;;  %p864_p6 = por %p863_p2, %p862_p9 }
  0x51   : > { %p865_p13 = pnand %p864_p6, %p858_p8 }
  0x53   : > { %868 = shalt.err (!%p865_p13)
}
  0x54   : > { %735 = dma.hbm_to_vmem [thread:$0]  (!%p1132_p0), %s1190_s9, 128, %s1193_s10, %s193_s1  }
  0x55   : > { %s233_s19 = scalar_lea.vmem [#allocation7], %s1125_s6  ;;  %s869_s29 = scalar_lea.hbm %s1199_s23, 128 }
  0x56   : > { %s240_s20 = sshll.u32 %s233_s19, 4  ;;  %p870_p11 = scmp.ne.s32.totalorder %s1199_s23, %s869_s29  ;;  %s241_s20 = int_to_ptr.vmem [resolvable:$true] %s240_s20 }
  0x57   : > { %s874_s26 = scalar_lea.hbm %s1360_s2, 256  ;;  %p875_p5 = scmp.lt.u32.totalorder %s1199_s23, %s1360_s2 }
  0x58   : > { %p872_p2 = pnand %p870_p11, %p1154_p4  ;;  %p876_p7 = scmp.lt.u32.totalorder %s874_s26, %s869_s29 }
  0x59   : > { %p878_p12 = scmp.lt.u32.totalorder %s869_s29, %s1199_s23 }
  0x5a   : > { %p873_p3 = pneg %p872_p2  ;;  %p877_p10 = por %p876_p7, %p875_p5 }
  0x5c   : > { %p879_p1 = por %p878_p12, %p877_p10 }
  0x5e   : > { %p880_p8 = pnand %p879_p1, %p873_p3 }
  0x60   : > { %883 = shalt.err (!%p880_p8)
}
  0x61   : > { %s884_s1 = scalar_lea.vmem %s241_s20, 128  ;;  %s1023_s9 = smov [#allocation7]  }
  0x62   : > { %p885_p9 = scmp.ne.s32.totalorder %s241_s20, %s884_s1  ;;  %s889_s10 = sshll.u32 %s1023_s9, 4  ;;  %s890_s10 = int_to_ptr.vmem [resolvable:$false] %s889_s10 }
  0x63   : > { %s891_s17 = scalar_lea.vmem %s890_s10, 256  ;;  %p892_p11 = scmp.lt.s32.totalorder %s241_s20, %s890_s10 }
  0x64   : > { %p887_p6 = pnand %p885_p9, %p1154_p4  ;;  %p893_p2 = scmp.lt.s32.totalorder %s891_s17, %s884_s1 }
  0x66   : > { %p888_p13 = pneg %p887_p6  ;;  %p894_p0 = por %p893_p2, %p892_p11 }
  0x68   : > { %p895_p5 = pnand %p894_p0, %p888_p13 }
  0x6a   : > { %898 = shalt.err (!%p895_p5)
}
  0x6b   : > { %p1388_p7 = scmp.ne.s32.totalorder %s1382_s8, 0  ;;  %s1246_s11 = scalar_lea.hbm %s1361_s3, %s1128_s7 }
  0x6c   : > { %s251_s13 = scalar_lea.vmem [#allocation8], %s1125_s6  ;;  %s248_s12 = scalar_lea.sflag [#allocation9], %s1122_s5 }
  0x6d   : > { %741 = dma.hbm_to_vmem [thread:$0]  (!%p1388_p7), %s1199_s23, 128, %s241_s20, %s1148_s22  }
  0x6e   : > { %s259_s26 = sshll.u32 %s251_s13, 4  ;;  %s899_s14 = scalar_lea.hbm %s1246_s11, 128  ;;  %s260_s26 = int_to_ptr.vmem [resolvable:$true] %s259_s26 }
  0x6f   : > { %p900_p0 = scmp.ne.s32.totalorder %s1246_s11, %s899_s14  ;;  %s904_s23 = scalar_lea.hbm %s1361_s3, 256 }
  0x70   : > { %p905_p12 = scmp.lt.u32.totalorder %s1246_s11, %s1361_s3  ;;  %p906_p1 = scmp.lt.u32.totalorder %s904_s23, %s899_s14 }
  0x71   : > { %p902_p3 = pnand %p900_p0, %p1154_p4  ;;  %p908_p9 = scmp.lt.u32.totalorder %s899_s14, %s1246_s11 }
  0x72   : > { %p907_p8 = por %p906_p1, %p905_p12 }
  0x73   : > { %p903_p10 = pneg %p902_p3 }
  0x74   : > { %p909_p6 = por %p908_p9, %p907_p8 }
  0x76   : > { %p910_p13 = pnand %p909_p6, %p903_p10 }
  0x78   : > { %913 = shalt.err (!%p910_p13)
}
  0x79   : > { %s914_s5 = scalar_lea.vmem %s260_s26, 128  ;;  %s1024_s6 = smov [#allocation8]  }
  0x7a   : > { %p915_p11 = scmp.ne.s32.totalorder %s260_s26, %s914_s5  ;;  %s919_s9 = sshll.u32 %s1024_s6, 4  ;;  %s920_s9 = int_to_ptr.vmem [resolvable:$false] %s919_s9 }
  0x7b   : > { %s921_s10 = scalar_lea.vmem %s920_s9, 256  ;;  %p922_p0 = scmp.lt.s32.totalorder %s260_s26, %s920_s9 }
  0x7c   : > { %p917_p2 = pnand %p915_p11, %p1154_p4  ;;  %p923_p3 = scmp.lt.s32.totalorder %s921_s10, %s914_s5 }
  0x7e   : > { %p918_p5 = pneg %p917_p2  ;;  %p924_p7 = por %p923_p3, %p922_p0 }
  0x80   : > { %p925_p1 = pnand %p924_p7, %p918_p5 }
  0x82   : > { %928 = shalt.err (!%p925_p1)
}
  0x83   : > { %p1389_p12 = scmp.ne.s32.totalorder %s1382_s8, 0  ;;  %p1390_p10 = scmp.ne.s32.totalorder %s1387_s24, 0 }
  0x84   : > { %s1270_s25 = sand.u32 (!%p1390_p10), 1, %s1003_s16   ;;  %p1391_p4 = scmp.ne.s32.totalorder (!%p1390_p10), %s1378_s27, 0 }
  0x85   : > { %744 = dma.hbm_to_vmem [thread:$0]  (!%p1389_p12), %s1246_s11, 128, %s260_s26, %s248_s12  }
  0x86   : > { %268 = sbr.rel (%p1390_p10) target bundleno = 1222 (0x4c6), region = 36  ;;  %s1273_s17 = sshll.u32 (!%p1390_p10), %s1270_s25, 3 }
  0x87   : > { %s271_s19 = scalar_lea.sflag (!%p1390_p10), [#allocation3], %s1270_s25  ;;  %s274_s29 = scalar_lea.vmem (!%p1390_p10), [#allocation2], %s1273_s17 }
  0x8d   : > { %982 = dma.done.wait (%p1391_p4), %s271_s19, 128  }
  0x8e   : > { %984 = vsyncadd (%p1391_p4), %s271_s19, 4294967168  ;;  %s279_s8 = sand.u32 1, %s1084_s21   ;;  %s283_s11 = scalar_lea.vmem [#allocation5], %s1273_s17 }
  0x8f   : > { %s280_s24 = scalar_lea.sflag [#allocation6], %s279_s8 }
  0x90   : > { %986 = dma.done.wait (%p1391_p4), %s280_s24, 256  }
  0x91   : > { %988 = vsyncadd (%p1391_p4), %s280_s24, 4294967040  ;;  %s292_s13 = scalar_lea.vmem [#allocation7], %s1273_s17  ;;  %s298_s26 = scalar_lea.sflag [#allocation9], %s1270_s25 }
  0x92   : > { %s301_s12 = scalar_lea.vmem [#allocation8], %s1273_s17 }
  0x93   : > { %990 = dma.done.wait (%p1391_p4), %s298_s26, 128  }
  0x94   : > { %992 = vsyncadd (%p1391_p4), %s298_s26, 4294967168  ;;  %v1025_v0 = vmov 0.0   ;;  %vm1026_vm0 = vmmov 0   ;;  %vm344_vm1 = vcmask 261120   ;;  %v343_v1 = vld [vmem:[%s283_s11] sm:$0xff]  ;;  %v341_v2 = vld [vmem:[%s274_s29] sm:$0xff] }
  0x95   : > { %712 = vmatprep.subr.mxu0 %v1025_v0  ;;  %714 = vmatprep.mubr.msk.f32.mxu0 %vm1026_vm0, %v1025_v0  ;;  %v342_v3 = vmul.f32 0.17677669, %v341_v2  ;;  %vm421_vm2 = vcmask 64512   ;;  %v433_v14 = vld [vmem:[%s301_s12] sm:$0xff]  ;;  %v446_v23 = vld [vmem:[%s292_s13] sm:$0xff]  ;;  %s705_s21 = sshll.u32 %s1011_s18, 7 }
  0x96   : > { %717 = vmatprep.subr.mxu1 %v1025_v0  ;;  %719 = vmatprep.mubr.msk.f32.mxu1 %vm1026_vm0, %v1025_v0  ;;  %s340_s27 = scalar_lea.vmem [#allocation10], %s1273_s17  ;;  %s1308_s23 = scalar_lea.hbm %s1362_s4, %s705_s21 }
  0x97   : > { %713 = vmatpush3.xpose.msk.msra.mxu0 %vm344_vm1, %v343_v1  ;;  %718 = vmatpush3.msra.mxu1 %v446_v23  ;;  %s536_s14 = sshll.u32 %s340_s27, 4  ;;  %s522_s20 = scalar_lea.sflag [#allocation4], %s1270_s25  ;;  %s1310_s14 = int_to_ptr.vmem [resolvable:$true] %s536_s14 }
  0x98   : > { %s929_s7 = scalar_lea.vmem %s1310_s14, 128  ;;  %p1392_p8 = scmp.ne.s32.totalorder %s1379_s28, 0 }
  0x99   : > { %p930_p7 = scmp.ne.s32.totalorder %s1310_s14, %s929_s7  ;;  %s1027_s18 = smov [#allocation10]  }
  0x9a   : > { %715 = vmatmul.mubr.msk.f32.vlgmr.msra.gmra.mrb[0].mxu0 %vm344_vm1, %v342_v3  ;;  %s933_s5 = sshll.u32 %s1027_s18, 4  ;;  %s934_s5 = int_to_ptr.vmem [resolvable:$false] %s933_s5 }
  0x9b   : > { %p931_p9 = pnand %p930_p7, %p1392_p8  ;;  %s935_s6 = scalar_lea.vmem %s934_s5, 256 }
  0x9c   : > { %p936_p13 = scmp.lt.s32.totalorder %s1310_s14, %s934_s5  ;;  %p937_p11 = scmp.lt.s32.totalorder %s935_s6, %s929_s7 }
  0x9d   : > { %p932_p6 = pneg %p931_p9 }
  0x9e   : > { %p938_p2 = por %p937_p11, %p936_p13 }
  0xa0   : > { %p939_p5 = pnand %p938_p2, %p932_p6 }
 0x16d   : > { %v417_v4 = vpop.f32.mrb[0].mxu0 }
 0x16e   : > { %v716_v5 = vpop.f32.mrb[1].mxu0  ;;  %v422_v6 = vsel %vm421_vm2, %v417_v4, -inf }
 0x16f   : > { %423 = vmax.xlane.f32.xlu0 %v422_v6 }
 0x1fc   : > { %v424_v7 = vpop.xlane.xlu0 %423 }
 0x1fd   : > { %v425_v8 = vsub.f32 %v417_v4, %v424_v7 }
 0x1ff   : > { %v426_v9 = vmul.f32 1.442695, %v425_v8 }
 0x201   : > { %801 = vpow2.f32 %v426_v9 }
 0x20b   : > { %v802_v10 = vpop.eup %801 }
 0x20c   : > { %v428_v11 = vsel %vm421_vm2, %v802_v10, 0.0 }
 0x20d   : > { %429 = vadd.xlane.f32.xlu0 %v428_v11 }
 0x29a   : > { %v430_v12 = vpop.xlane.xlu0 %429 }
 0x29b   : > { %803 = vrcp.f32 %v430_v12 }
 0x2a5   : > { %v804_v13 = vpop.eup %803 }
 0x2a6   : > { %v432_v15 = vmul.f32 %v804_v13, %v802_v10 }
 0x2a8   : > { %v434_v16 = vmul.f32 %v433_v14, %v432_v15 }
 0x2aa   : > { %v435_v17 = vsel %vm421_vm2, %v434_v16, -inf }
 0x2ab   : > { %436 = vmax.xlane.f32.xlu1 %v435_v17 }
 0x338   : > { %v437_v18 = vpop.xlane.xlu1 %436 }
 0x339   : > { %v438_v19 = vsub.f32 %v434_v16, %v437_v18 }
 0x33b   : > { %v439_v20 = vmul.f32 1.442695, %v438_v19 }
 0x33d   : > { %805 = vpow2.f32 %v439_v20 }
 0x347   : > { %v806_v21 = vpop.eup %805 }
 0x348   : > { %v441_v22 = vsel %vm421_vm2, %v806_v21, 0.0 }
 0x349   : > { %442 = vadd.xlane.f32.xlu1 %v441_v22 }
 0x3d6   : > { %v443_v24 = vpop.xlane.xlu1 %442 }
 0x3d7   : > { %807 = vrcp.f32 %v443_v24 }
 0x3e1   : > { %v808_v25 = vpop.eup %807 }
 0x3e2   : > { %v445_v26 = vmul.f32 %v808_v25, %v806_v21 }
 0x3e4   : > { %720 = vmatmul.mubr.msk.f32.vlgmr.msra.gmra.mrb[0].mxu1 %vm421_vm2, %v445_v26 }
 0x4b7   : > { %v516_v27 = vpop.f32.mrb[0].mxu1 }
 0x4b8   : > { %520 = vst.msk [vmem:[%s340_s27] sm:$0xff] %vm344_vm1, %v516_v27  ;;  %v721_v28 = vpop.f32.mrb[1].mxu1 }
 0x4b9   : > { %942 = shalt.err (!%p939_p5)
}
 0x4ba   : > { %s943_s9 = scalar_lea.hbm %s1308_s23, 128  ;;  %s947_s17 = scalar_lea.hbm %s1362_s4, 256 }
 0x4bb   : > { %p944_p0 = scmp.ne.s32.totalorder %s1308_s23, %s943_s9  ;;  %p948_p12 = scmp.lt.u32.totalorder %s1308_s23, %s1362_s4 }
 0x4bc   : > { %p949_p10 = scmp.lt.u32.totalorder %s947_s17, %s943_s9  ;;  %p951_p7 = scmp.lt.u32.totalorder %s943_s9, %s1308_s23 }
 0x4bd   : > { %p945_p3 = pnand %p944_p0, %p1392_p8 }
 0x4be   : > { %p950_p4 = por %p949_p10, %p948_p12 }
 0x4bf   : > { %p946_p1 = pneg %p945_p3 }
 0x4c0   : > { %p952_p9 = por %p951_p7, %p950_p4 }
 0x4c2   : > { %p953_p6 = pnand %p952_p9, %p946_p1 }
 0x4c4   : > { %956 = shalt.err (!%p953_p6)
}
 0x4c5   : > { %730 = dma.vmem_to_hbm [thread:$0]  (%p1392_p8), %s1310_s14, 128, %s1308_s23, %s522_s20  }
 0x4c6 PF: > { %s1393_s8 = sld [smem:[#allocation17_spill]]  ;;  %s548_s24 = sand.u32 1, %s999_s15  }
 0x4c7   : > { %p1394_p13 = scmp.ne.s32.totalorder %s1381_s30, 0  ;;  %s549_s11 = scalar_lea.sflag [#allocation4], %s548_s24 }
 0x4cc   : > { %p1395_p11 = scmp.ge.s32.totalorder %s1393_s8, 2 }
 0x4ce   : > { %p746_p2 = pnand %p1395_p11, %p1394_p13 }
 0x4d0   : > { %994 = dma.done.wait (!%p746_p2), %s549_s11, 128  }
 0x4d1   : > { %996 = vsyncadd (!%p746_p2), %s549_s11, 4294967168  ;;  %s26_s20 = sadd.s32 1, %s1393_s8   ;;  %s1396_s13 = sld [smem:[#allocation15_spill]] }
 0x4d2   : > { %p23_p5 = scmp.ge.s32.totalorder %s26_s20, 4   ;;  %s1397_s17 = sld [smem:[#allocation19_spill]] }
 0x4d3   : > { %s1398_s18 = sld [smem:[#allocation16_spill]]  ;;  %s1399_s19 = sld [smem:[#allocation18_spill]] }
 0x4d4   : > { %s1400_s15 = smov %s1003_s16  ;;  %25 = sbr.rel (!%p23_p5) target bundleno = 12 (0xc), region = 118 }
 0x4d7   : > { %s1401_s16 = smov %s1396_s13 }
 0x4db   :  { %554 = vsyncpa [#allocation3], 1 }
 0x4dc   :  { %556 = vsyncpa [#allocation3 + $0x1], 1 }
 0x4dd   :  { %557 = vsyncpa [#allocation6], 1 }
 0x4de   :  { %559 = vsyncpa [#allocation6 + $0x1], 1 }
 0x4df   :  { %560 = vsyncpa [#allocation9], 1 }
 0x4e0   :  { %562 = vsyncpa [#allocation9 + $0x1], 1 }
 0x4e1   :  { %563 = vsyncpa [#allocation4], 1 }
 0x4e2   :  { %565 = vsyncpa [#allocation4 + $0x1], 1 }

</bundles_post_ra>
